<compile_context>
chip_gen: v7x
topology: tpu7x:2x2x1
jax: 0.10.0
libtpu: 0.0.40
codegen_flags: <defaults>
</compile_context>

<pallas_src>
import functools
import math

import jax
import jax.numpy as jnp
import numpy as np
from jax import lax
from jax.experimental import pallas as pl
from jax.experimental.pallas import tpu as pltpu

PARAM_ORDER = ("dw_w", "dw_b", "ln_w", "ln_b", "w1", "b1",
               "gamma", "beta", "w2", "b2")

_INV_SQRT2 = 1.0 / math.sqrt(2.0)


def _erf(x):
    # Abramowitz & Stegun 7.1.26 rational approximation (|err| <= 1.5e-7):
    # exact-GELU semantics well within test tolerance.  exp() and the divide
    # run on the EUP slot, which is otherwise idle next to the MXU.
    # TODO(synk): switch to lax.erf once erf lowering is guaranteed in Mosaic.
    p = 0.3275911
    a1, a2, a3, a4, a5 = (0.254829592, -0.284496736, 1.421413741,
                          -1.453152027, 1.061405429)
    sign = jnp.where(x >= 0.0, 1.0, -1.0)
    ax = jnp.abs(x)
    t = 1.0 / (1.0 + p * ax)                 # exact reciprocal (EUP)
    poly = ((((a5 * t + a4) * t + a3) * t + a2) * t + a1) * t
    return sign * (1.0 - poly * jnp.exp(-ax * ax))


def _gelu_exact(x):
    return 0.5 * x * (1.0 + _erf(x * _INV_SQRT2))


def _convnextv2_kernel(x_ref, dww_ref, dwb_ref, lnw_ref, lnb_ref,
                       w1_ref, b1_ref, gamma_ref, beta_ref, w2_ref, b2_ref,
                       o_ref, *, kernel_size, seq_len, batch_tile):
    """One grid step == `batch_tile` samples flattened to (batch_tile*T, C) rows."""
    K = kernel_size
    pad = K // 2
    T = seq_len
    bt = batch_tile
    R = bt * T

    x = x_ref[...].astype(jnp.float32)       # (R, C): conv input AND residual

    # Per-row time index within its own sample, computed in-kernel (no extra
    # DMA stream).  Mod-free: q = floor((r + 0.5)/T) via f32 mul + truncating
    # int cast; exact because r << 2^24 and the 0.5 nudge dominates rounding.
    ri = lax.broadcasted_iota(jnp.int32, (R, 1), 0)
    if bt == 1:
        t_idx = ri
    else:
        q = ((ri.astype(jnp.float32) + 0.5) * (1.0 / T)).astype(jnp.int32)
        t_idx = ri - q * T

    # ---- depthwise Conv1d (stride=1, zero 'same' padding, groups=dim) -------
    # Taps come from pltpu.roll of the already-loaded tile (XLU slot); rows
    # whose tap would cross a sample boundary (or wrap around the chunk edge)
    # are zeroed by the hoisted boundary masks -> exact zero padding, no scratch.
    masks = {}
    for k in range(K):
        s = k - pad
        if s < 0:
            masks[s] = t_idx >= -s
        elif s > 0:
            masks[s] = t_idx < T - s

    dww = dww_ref[...]                        # (K, C)
    y = None
    for k in range(K):                        # static small loop
        s = k - pad
        tap = x if s == 0 else pltpu.roll(x, shift=(-s) % R, axis=0)
        contrib = dww[k:k + 1, :] * tap
        if s != 0:
            contrib = jnp.where(masks[s], contrib, 0.0)
        y = contrib if y is None else y + contrib
    y = y + dwb_ref[...]                      # conv bias added once at the end

    # ---- LayerNorm over channels (eps = 1e-6, logical C) ---------------------
    mu = jnp.mean(y, axis=-1, keepdims=True)
    yc = y - mu
    var = jnp.mean(yc * yc, axis=-1, keepdims=True)
    y = yc * lax.rsqrt(var + 1e-6)
    y = y * lnw_ref[...] + lnb_ref[...]

    # ---- pointwise Linear C -> 4C (MXU, f32 accumulate) + exact GELU ---------
    h = jnp.dot(y.astype(w1_ref.dtype), w1_ref[...],
                preferred_element_type=jnp.float32) + b1_ref[...]
    h = _gelu_exact(h)                        # exact GELU (nn.GELU default)

    # ---- GRN (per sample, L2 over full T) fused with Linear 4C -> C + residual
    gamma = gamma_ref[...]
    beta = beta_ref[...]
    C4 = h.shape[-1]
    if T % 8 == 0:
        # Fused path: one big matmul over all rows, one lane-dense store.
        hr = h.reshape(bt, T, C4)                                  # free (T % 8 == 0)
        gx = jnp.sqrt(jnp.sum(hr * hr, axis=1, keepdims=True))     # (bt, 1, 4C)
        nx = gx / (jnp.mean(gx, axis=-1, keepdims=True) + 1e-6)
        # gamma*(h*nx) + beta + h  ==  h*(gamma*nx + 1) + beta     (fused epilogue)
        h = (hr * (gamma * nx + 1.0) + beta).reshape(R, C4)
        out = jnp.dot(h.astype(w2_ref.dtype), w2_ref[...],
                      preferred_element_type=jnp.float32) + b2_ref[...]
        o_ref[...] = (out + x).astype(o_ref.dtype)
    else:
        # Fallback for non sublane-aligned T (per-sample slices stay legal).
        w2 = w2_ref[...]
        b2 = b2_ref[...]
        for j in range(bt):
            lo = j * T
            hj = h[lo:lo + T, :]
            gx = jnp.sqrt(jnp.sum(hj * hj, axis=0, keepdims=True))
            nx = gx / (jnp.mean(gx, axis=-1, keepdims=True) + 1e-6)
            hj = hj * (gamma * nx + 1.0) + beta
            outj = jnp.dot(hj.astype(w2.dtype), w2,
                           preferred_element_type=jnp.float32) + b2
            o_ref[lo:lo + T, :] = (outj + x[lo:lo + T, :]).astype(o_ref.dtype)


def _default_batch_tile(B, T):
    """rows = bt*T near 512 (8-aligned), prefer >=2 grid steps (v7x has 2 TCs)."""
    cands = [bt for bt in range(1, B + 1)
             if B % bt == 0 and ((bt * T) % 8 == 0 or bt == B)]

    def score(bt):
        rows = bt * T
        grid = B // bt
        return (rows > 2048,                   # keep VMEM headroom (v7x: 64 MiB/TC)
                B > 1 and grid < 2,            # keep both v7x TensorCores busy
                abs(rows - 512),               # MXU M-dim / step-overhead sweet spot
                grid % 2 if grid > 1 else 0)   # prefer an even grid split
    return min(cands, key=score)


def convnextv2_block_ntc(x_btc, params, *, kernel_size=3, batch_tile=None,
                         matmul_dtype=jnp.bfloat16, interpret=False):
    """ConvNeXtV2 block on a channels-last (B, T, C) activation (no transposes)."""
    B, T, C = x_btc.shape
    assert kernel_size % 2 == 1, "'same' depthwise conv requires an odd kernel"

    if batch_tile is None:
        batch_tile = _default_batch_tile(B, T)
    bt = max(1, min(int(batch_tile), B))
    while B % bt:
        bt -= 1
    if (bt * T) % 8 != 0 and bt != B:
        bt = B            # row block must be sublane-aligned unless it spans B*T
    rows = bt * T
    grid = (B // bt,)

    xf = x_btc.reshape(B * T, C)               # native dtype; row-major, free

    w = dict(params)
    w["w1"] = params["w1"].astype(matmul_dtype)        # bf16 MXU inputs (default)
    w["w2"] = params["w2"].astype(matmul_dtype)

    kern = functools.partial(_convnextv2_kernel, kernel_size=kernel_size,
                             seq_len=T, batch_tile=bt)

    # NOTE: in real configs dim is a multiple of 128 (e.g. 512), so the single
    # full-tile output store is lane-dense; the demo C=4 is intentionally tiny.
    out = pl.pallas_call(
        kern,
        out_shape=jax.ShapeDtypeStruct((B * T, C), x_btc.dtype),
        grid=grid,
        in_specs=[pl.BlockSpec((rows, C), lambda i: (i, 0))]
                 + [pl.BlockSpec(w[name].shape, lambda i: (0, 0))
                    for name in PARAM_ORDER],
        out_specs=pl.BlockSpec((rows, C), lambda i: (i, 0)),
        compiler_params=pltpu.CompilerParams(
            dimension_semantics=("parallel",),
            # <= 48 MiB: safe inside v7x's 64 MiB/TC physical VMEM while still
            # allowing rows ~512..1024 at C=512 on v5e/v6e.
            vmem_limit_bytes=48 * 1024 * 1024),
        interpret=interpret,
    )(xf, *[w[name] for name in PARAM_ORDER])
    return out.reshape(B, T, C)


def convnextv2_block(x_nct, params, **kw):
    """PyTorch Conv1d layout (B, C, T).  The two transposes are the only extra
    HBM round trips left; call convnextv2_block_ntc directly from a
    channels-last model to avoid them."""
    out = convnextv2_block_ntc(jnp.transpose(x_nct, (0, 2, 1)), params, **kw)
    return jnp.transpose(out, (0, 2, 1))


def reference(x_nct, params, *, kernel_size=3):
    """Pure-JAX f32 reference of the PyTorch forward (stride=1, mask=None)."""
    pad = kernel_size // 2
    x = jnp.transpose(x_nct, (0, 2, 1)).astype(jnp.float32)      # (B, T, C)
    B, T, C = x.shape
    xp = jnp.pad(x, ((0, 0), (pad, pad), (0, 0)))
    y = jnp.broadcast_to(params["dw_b"], x.shape)
    for k in range(kernel_size):
        y = y + params["dw_w"][k] * xp[:, k:k + T, :]
    mu = jnp.mean(y, axis=-1, keepdims=True)
    var = jnp.mean((y - mu) ** 2, axis=-1, keepdims=True)
    y = (y - mu) / jnp.sqrt(var + 1e-6) * params["ln_w"] + params["ln_b"]
    h = jnp.einsum("btc,ce->bte", y, params["w1"],
                   precision=jax.lax.Precision.HIGHEST) + params["b1"]
    h = jax.nn.gelu(h, approximate=False)
    gx = jnp.sqrt(jnp.sum(h * h, axis=1, keepdims=True))         # (B, 1, 4C)
    nx = gx / (jnp.mean(gx, axis=-1, keepdims=True) + 1e-6)
    h = params["gamma"] * (h * nx) + params["beta"] + h
    out = jnp.einsum("bte,ec->btc", h, params["w2"],
                     precision=jax.lax.Precision.HIGHEST) + params["b2"]
    out = out + x
    return jnp.transpose(out, (0, 2, 1))


def make_params(key, dim, kernel_size=3, expansion_ratio=4):
    ce = expansion_ratio * dim
    keys = jax.random.split(key, 10)
    kb = 1.0 / math.sqrt(kernel_size)      # depthwise conv fan_in = 1 * K
    b1b = 1.0 / math.sqrt(dim)
    b2b = 1.0 / math.sqrt(ce)
    # NOTE: the PyTorch module zero-inits biases and GRN gamma/beta; small
    # non-zero values are used so every term of the forward is exercised.
    return {
        "dw_w": jax.random.uniform(keys[0], (kernel_size, dim), jnp.float32, -kb, kb),
        "dw_b": 0.1 * jax.random.normal(keys[1], (1, dim), jnp.float32),
        "ln_w": 1.0 + 0.1 * jax.random.normal(keys[2], (1, dim), jnp.float32),
        "ln_b": 0.1 * jax.random.normal(keys[3], (1, dim), jnp.float32),
        "w1": jax.random.uniform(keys[4], (dim, ce), jnp.float32, -b1b, b1b),
        "b1": 0.1 * jax.random.normal(keys[5], (1, ce), jnp.float32),
        "gamma": 0.1 * jax.random.normal(keys[6], (1, ce), jnp.float32),
        "beta": 0.1 * jax.random.normal(keys[7], (1, ce), jnp.float32),
        "w2": jax.random.uniform(keys[8], (ce, dim), jnp.float32, -b2b, b2b),
        "b2": 0.1 * jax.random.normal(keys[9], (1, dim), jnp.float32),
    }


if __name__ == "__main__":
    key = jax.random.PRNGKey(0)
    k_x, k_p = jax.random.split(key)
    B, dim, T = 2, 4, 16
    x = jax.random.normal(k_x, (B, dim, T), dtype=jnp.float32)   # NCT input
    params = make_params(k_p, dim)

    ref = reference(x, params)

    # Tight check of the kernel math with f32 matmuls (default batch_tile -> bt=1).
    out_f32 = jax.block_until_ready(
        convnextv2_block(x, params, matmul_dtype=jnp.float32))
    np.testing.assert_allclose(np.asarray(out_f32), np.asarray(ref),
                               rtol=2e-3, atol=2e-3)

    # Multi-sample chunk path: exercises in-kernel t_idx, the sample-boundary
    # masks of the rolled taps and the batched (bt, T, 4C) GRN reduction.
    out_bt2 = jax.block_until_ready(
        convnextv2_block(x, params, matmul_dtype=jnp.float32, batch_tile=2))
    np.testing.assert_allclose(np.asarray(out_bt2), np.asarray(ref),
                               rtol=2e-3, atol=2e-3)

    # Default bf16-MXU path; looser tolerance purely from bf16 rounding of the
    # matmul inputs (accumulation stays f32).
    out_bf16 = jax.block_until_ready(convnextv2_block(x, params))
    np.testing.assert_allclose(np.asarray(out_bf16), np.asarray(ref),
                               rtol=3e-2, atol=3e-2)

    print("KERNEL_OK")
</pallas_src>

<mosaic_0001>
module attributes {stable_mosaic.version = 11 : i64} {
  func.func @_convnextv2_kernel(%arg0: i32, %arg1: memref<16x4xf32, #tpu.memory_space<vmem>>, %arg2: memref<3x4xf32, #tpu.memory_space<vmem>>, %arg3: memref<1x4xf32, #tpu.memory_space<vmem>>, %arg4: memref<1x4xf32, #tpu.memory_space<vmem>>, %arg5: memref<1x4xf32, #tpu.memory_space<vmem>>, %arg6: memref<4x16xf32, #tpu.memory_space<vmem>>, %arg7: memref<1x16xf32, #tpu.memory_space<vmem>>, %arg8: memref<1x16xf32, #tpu.memory_space<vmem>>, %arg9: memref<1x16xf32, #tpu.memory_space<vmem>>, %arg10: memref<16x4xf32, #tpu.memory_space<vmem>>, %arg11: memref<1x4xf32, #tpu.memory_space<vmem>>, %arg12: memref<16x4xf32, #tpu.memory_space<vmem>>) attributes {dimension_semantics = [#tpu.dimension_semantics<parallel>], iteration_bounds = array<i64: 2>, scalar_prefetch = 0 : i64, scratch_operands = 0 : i64, tpu.core_type = #tpu.core_type<tc>, window_params = [{transform_indices = @transform_0, window_bounds = array<i64: 16, 4>}, {pipeline_mode = #tpu.pipeline_mode<synchronous>, transform_indices = @transform_1, window_bounds = array<i64: 3, 4>}, {pipeline_mode = #tpu.pipeline_mode<synchronous>, transform_indices = @transform_2, window_bounds = array<i64: 1, 4>}, {pipeline_mode = #tpu.pipeline_mode<synchronous>, transform_indices = @transform_3, window_bounds = array<i64: 1, 4>}, {pipeline_mode = #tpu.pipeline_mode<synchronous>, transform_indices = @transform_4, window_bounds = array<i64: 1, 4>}, {pipeline_mode = #tpu.pipeline_mode<synchronous>, transform_indices = @transform_5, window_bounds = array<i64: 4, 16>}, {pipeline_mode = #tpu.pipeline_mode<synchronous>, transform_indices = @transform_6, window_bounds = array<i64: 1, 16>}, {pipeline_mode = #tpu.pipeline_mode<synchronous>, transform_indices = @transform_7, window_bounds = array<i64: 1, 16>}, {pipeline_mode = #tpu.pipeline_mode<synchronous>, transform_indices = @transform_8, window_bounds = array<i64: 1, 16>}, {pipeline_mode = #tpu.pipeline_mode<synchronous>, transform_indices = @transform_9, window_bounds = array<i64: 16, 4>}, {pipeline_mode = #tpu.pipeline_mode<synchronous>, transform_indices = @transform_10, window_bounds = array<i64: 1, 4>}, {transform_indices = @transform_11, window_bounds = array<i64: 16, 4>}]} {
    %c0 = arith.constant 0 : index
    %c0_0 = arith.constant 0 : index
    %0 = vector.load %arg1[%c0, %c0_0] : memref<16x4xf32, #tpu.memory_space<vmem>>, vector<16x4xf32>
    %1 = tpu.iota {dimensions = array<i32: 0>} : vector<16x1xi32>
    %c1_i32 = arith.constant 1 : i32
    %2 = vector.broadcast %c1_i32 : i32 to vector<16x1xi32>
    %3 = arith.cmpi sge, %1, %2 : vector<16x1xi32>
    %c15_i32 = arith.constant 15 : i32
    %4 = vector.broadcast %c15_i32 : i32 to vector<16x1xi32>
    %5 = arith.cmpi slt, %1, %4 : vector<16x1xi32>
    %c0_1 = arith.constant 0 : index
    %c0_2 = arith.constant 0 : index
    %6 = vector.load %arg2[%c0_1, %c0_2] : memref<3x4xf32, #tpu.memory_space<vmem>>, vector<3x4xf32>
    %c1_i32_3 = arith.constant 1 : i32
    %7 = tpu.dynamic_rotate %0 by %c1_i32_3 dim 0 : vector<16x4xf32>, i32 -> vector<16x4xf32>
    %8 = vector.extract_strided_slice %6 {offsets = [0, 0], sizes = [1, 4], strides = [1, 1]} : vector<3x4xf32> to vector<1x4xf32>
    %9 = vector.broadcast %8 : vector<1x4xf32> to vector<16x4xf32>
    %10 = arith.mulf %9, %7 : vector<16x4xf32>
    %cst = arith.constant 0.000000e+00 : f32
    %11 = vector.shape_cast %3 : vector<16x1xi1> to vector<16x1xi1>
    %12 = vector.broadcast %11 : vector<16x1xi1> to vector<16x4xi1>
    %13 = vector.broadcast %cst : f32 to vector<16x4xf32>
    %14 = arith.select %12, %10, %13 : vector<16x4xi1>, vector<16x4xf32>
    %15 = vector.extract_strided_slice %6 {offsets = [1, 0], sizes = [1, 4], strides = [1, 1]} : vector<3x4xf32> to vector<1x4xf32>
    %16 = vector.broadcast %15 : vector<1x4xf32> to vector<16x4xf32>
    %17 = arith.mulf %16, %0 : vector<16x4xf32>
    %18 = arith.addf %14, %17 : vector<16x4xf32>
    %c15_i32_4 = arith.constant 15 : i32
    %19 = tpu.dynamic_rotate %0 by %c15_i32_4 dim 0 : vector<16x4xf32>, i32 -> vector<16x4xf32>
    %20 = vector.extract_strided_slice %6 {offsets = [2, 0], sizes = [1, 4], strides = [1, 1]} : vector<3x4xf32> to vector<1x4xf32>
    %21 = vector.broadcast %20 : vector<1x4xf32> to vector<16x4xf32>
    %22 = arith.mulf %21, %19 : vector<16x4xf32>
    %cst_5 = arith.constant 0.000000e+00 : f32
    %23 = vector.shape_cast %5 : vector<16x1xi1> to vector<16x1xi1>
    %24 = vector.broadcast %23 : vector<16x1xi1> to vector<16x4xi1>
    %25 = vector.broadcast %cst_5 : f32 to vector<16x4xf32>
    %26 = arith.select %24, %22, %25 : vector<16x4xi1>, vector<16x4xf32>
    %27 = arith.addf %18, %26 : vector<16x4xf32>
    %c0_6 = arith.constant 0 : index
    %c0_7 = arith.constant 0 : index
    %28 = vector.load %arg3[%c0_6, %c0_7] : memref<1x4xf32, #tpu.memory_space<vmem>>, vector<1x4xf32>
    %29 = vector.broadcast %28 : vector<1x4xf32> to vector<16x4xf32>
    %30 = arith.addf %27, %29 : vector<16x4xf32>
    %cst_8 = arith.constant dense<0.000000e+00> : vector<16xf32>
    %31 = vector.multi_reduction <add>, %30, %cst_8 [1] : vector<16x4xf32> to vector<16xf32>
    %32 = vector.shape_cast %31 : vector<16xf32> to vector<16x1xf32>
    %cst_9 = arith.constant 4.000000e+00 : f32
    %33 = vector.broadcast %cst_9 : f32 to vector<16x1xf32>
    %34 = arith.divf %32, %33 : vector<16x1xf32>
    %35 = vector.broadcast %34 : vector<16x1xf32> to vector<16x4xf32>
    %36 = arith.subf %30, %35 : vector<16x4xf32>
    %37 = arith.mulf %36, %36 : vector<16x4xf32>
    %cst_10 = arith.constant dense<0.000000e+00> : vector<16xf32>
    %38 = vector.multi_reduction <add>, %37, %cst_10 [1] : vector<16x4xf32> to vector<16xf32>
    %39 = vector.shape_cast %38 : vector<16xf32> to vector<16x1xf32>
    %cst_11 = arith.constant 4.000000e+00 : f32
    %40 = vector.broadcast %cst_11 : f32 to vector<16x1xf32>
    %41 = arith.divf %39, %40 : vector<16x1xf32>
    %cst_12 = arith.constant 9.99999997E-7 : f32
    %42 = vector.broadcast %cst_12 : f32 to vector<16x1xf32>
    %43 = arith.addf %41, %42 : vector<16x1xf32>
    %44 = math.rsqrt %43 : vector<16x1xf32>
    %45 = vector.broadcast %44 : vector<16x1xf32> to vector<16x4xf32>
    %46 = arith.mulf %36, %45 : vector<16x4xf32>
    %c0_13 = arith.constant 0 : index
    %c0_14 = arith.constant 0 : index
    %47 = vector.load %arg4[%c0_13, %c0_14] : memref<1x4xf32, #tpu.memory_space<vmem>>, vector<1x4xf32>
    %48 = vector.broadcast %47 : vector<1x4xf32> to vector<16x4xf32>
    %49 = arith.mulf %46, %48 : vector<16x4xf32>
    %c0_15 = arith.constant 0 : index
    %c0_16 = arith.constant 0 : index
    %50 = vector.load %arg5[%c0_15, %c0_16] : memref<1x4xf32, #tpu.memory_space<vmem>>, vector<1x4xf32>
    %51 = vector.broadcast %50 : vector<1x4xf32> to vector<16x4xf32>
    %52 = arith.addf %49, %51 : vector<16x4xf32>
    %c0_17 = arith.constant 0 : index
    %c0_18 = arith.constant 0 : index
    %53 = vector.load %arg6[%c0_17, %c0_18] : memref<4x16xf32, #tpu.memory_space<vmem>>, vector<4x16xf32>
    %cst_19 = arith.constant dense<0.000000e+00> : vector<16x16xf32>
    %54 = tpu.matmul %52, %53, %cst_19 {dimension_numbers = #tpu.dot_dimension_numbers<[1], [0], [0], [1], [0, 0, 1, 1], [], []>} : vector<16x4xf32>, vector<4x16xf32>, vector<16x16xf32> -> vector<16x16xf32>
    %c0_20 = arith.constant 0 : index
    %c0_21 = arith.constant 0 : index
    %55 = vector.load %arg7[%c0_20, %c0_21] : memref<1x16xf32, #tpu.memory_space<vmem>>, vector<1x16xf32>
    %56 = vector.broadcast %55 : vector<1x16xf32> to vector<16x16xf32>
    %57 = arith.addf %54, %56 : vector<16x16xf32>
    %cst_22 = arith.constant 5.000000e-01 : f32
    %58 = vector.broadcast %cst_22 : f32 to vector<16x16xf32>
    %59 = arith.mulf %58, %57 : vector<16x16xf32>
    %cst_23 = arith.constant 0.707106769 : f32
    %60 = vector.broadcast %cst_23 : f32 to vector<16x16xf32>
    %61 = arith.mulf %57, %60 : vector<16x16xf32>
    %cst_24 = arith.constant 0.000000e+00 : f32
    %62 = vector.broadcast %cst_24 : f32 to vector<16x16xf32>
    %63 = arith.cmpf oge, %61, %62 : vector<16x16xf32>
    %cst_25 = arith.constant 1.000000e+00 : f32
    %cst_26 = arith.constant -1.000000e+00 : f32
    %64 = vector.broadcast %cst_25 : f32 to vector<16x16xf32>
    %65 = vector.broadcast %cst_26 : f32 to vector<16x16xf32>
    %66 = arith.select %63, %64, %65 : vector<16x16xi1>, vector<16x16xf32>
    %67 = math.absf %61 : vector<16x16xf32>
    %cst_27 = arith.constant 0.327591091 : f32
    %68 = vector.broadcast %cst_27 : f32 to vector<16x16xf32>
    %69 = arith.mulf %68, %67 : vector<16x16xf32>
    %cst_28 = arith.constant 1.000000e+00 : f32
    %70 = vector.broadcast %cst_28 : f32 to vector<16x16xf32>
    %71 = arith.addf %70, %69 : vector<16x16xf32>
    %cst_29 = arith.constant 1.000000e+00 : f32
    %72 = vector.broadcast %cst_29 : f32 to vector<16x16xf32>
    %73 = arith.divf %72, %71 : vector<16x16xf32>
    %cst_30 = arith.constant 1.06140542 : f32
    %74 = vector.broadcast %cst_30 : f32 to vector<16x16xf32>
    %75 = arith.mulf %74, %73 : vector<16x16xf32>
    %cst_31 = arith.constant -1.45315206 : f32
    %76 = vector.broadcast %cst_31 : f32 to vector<16x16xf32>
    %77 = arith.addf %75, %76 : vector<16x16xf32>
    %78 = arith.mulf %77, %73 : vector<16x16xf32>
    %cst_32 = arith.constant 1.42141378 : f32
    %79 = vector.broadcast %cst_32 : f32 to vector<16x16xf32>
    %80 = arith.addf %78, %79 : vector<16x16xf32>
    %81 = arith.mulf %80, %73 : vector<16x16xf32>
    %cst_33 = arith.constant -0.284496725 : f32
    %82 = vector.broadcast %cst_33 : f32 to vector<16x16xf32>
    %83 = arith.addf %81, %82 : vector<16x16xf32>
    %84 = arith.mulf %83, %73 : vector<16x16xf32>
    %cst_34 = arith.constant 0.254829586 : f32
    %85 = vector.broadcast %cst_34 : f32 to vector<16x16xf32>
    %86 = arith.addf %84, %85 : vector<16x16xf32>
    %87 = arith.mulf %86, %73 : vector<16x16xf32>
    %cst_35 = arith.constant 0.000000e+00 : f32
    %88 = vector.broadcast %cst_35 : f32 to vector<16x16xf32>
    %89 = arith.subf %88, %67 : vector<16x16xf32>
    %90 = arith.mulf %89, %67 : vector<16x16xf32>
    %91 = math.exp %90 : vector<16x16xf32>
    %92 = arith.mulf %87, %91 : vector<16x16xf32>
    %cst_36 = arith.constant 1.000000e+00 : f32
    %93 = vector.broadcast %cst_36 : f32 to vector<16x16xf32>
    %94 = arith.subf %93, %92 : vector<16x16xf32>
    %95 = arith.mulf %66, %94 : vector<16x16xf32>
    %cst_37 = arith.constant 1.000000e+00 : f32
    %96 = vector.broadcast %cst_37 : f32 to vector<16x16xf32>
    %97 = arith.addf %96, %95 : vector<16x16xf32>
    %98 = arith.mulf %59, %97 : vector<16x16xf32>
    %c0_38 = arith.constant 0 : index
    %c0_39 = arith.constant 0 : index
    %99 = vector.load %arg8[%c0_38, %c0_39] : memref<1x16xf32, #tpu.memory_space<vmem>>, vector<1x16xf32>
    %c0_40 = arith.constant 0 : index
    %c0_41 = arith.constant 0 : index
    %100 = vector.load %arg9[%c0_40, %c0_41] : memref<1x16xf32, #tpu.memory_space<vmem>>, vector<1x16xf32>
    %101 = vector.shape_cast %98 : vector<16x16xf32> to vector<1x16x16xf32>
    %102 = arith.mulf %101, %101 : vector<1x16x16xf32>
    %cst_42 = arith.constant dense<0.000000e+00> : vector<1x16xf32>
    %103 = vector.multi_reduction <add>, %102, %cst_42 [1] : vector<1x16x16xf32> to vector<1x16xf32>
    %104 = vector.shape_cast %103 : vector<1x16xf32> to vector<1x1x16xf32>
    %105 = math.sqrt %104 : vector<1x1x16xf32>
    %cst_43 = arith.constant dense<0.000000e+00> : vector<1x1xf32>
    %106 = vector.multi_reduction <add>, %105, %cst_43 [2] : vector<1x1x16xf32> to vector<1x1xf32>
    %107 = vector.shape_cast %106 : vector<1x1xf32> to vector<1x1x1xf32>
    %cst_44 = arith.constant 1.600000e+01 : f32
    %108 = vector.broadcast %cst_44 : f32 to vector<1x1x1xf32>
    %109 = arith.divf %107, %108 : vector<1x1x1xf32>
    %cst_45 = arith.constant 9.99999997E-7 : f32
    %110 = vector.broadcast %cst_45 : f32 to vector<1x1x1xf32>
    %111 = arith.addf %109, %110 : vector<1x1x1xf32>
    %112 = vector.broadcast %111 : vector<1x1x1xf32> to vector<1x1x16xf32>
    %113 = arith.divf %105, %112 : vector<1x1x16xf32>
    %114 = vector.shape_cast %99 : vector<1x16xf32> to vector<1x1x16xf32>
    %115 = arith.mulf %114, %113 : vector<1x1x16xf32>
    %cst_46 = arith.constant 1.000000e+00 : f32
    %116 = vector.broadcast %cst_46 : f32 to vector<1x1x16xf32>
    %117 = arith.addf %115, %116 : vector<1x1x16xf32>
    %118 = vector.broadcast %117 : vector<1x1x16xf32> to vector<1x16x16xf32>
    %119 = arith.mulf %101, %118 : vector<1x16x16xf32>
    %120 = vector.shape_cast %100 : vector<1x16xf32> to vector<1x1x16xf32>
    %121 = vector.broadcast %120 : vector<1x1x16xf32> to vector<1x16x16xf32>
    %122 = arith.addf %119, %121 : vector<1x16x16xf32>
    %123 = vector.shape_cast %122 : vector<1x16x16xf32> to vector<16x16xf32>
    %c0_47 = arith.constant 0 : index
    %c0_48 = arith.constant 0 : index
    %124 = vector.load %arg10[%c0_47, %c0_48] : memref<16x4xf32, #tpu.memory_space<vmem>>, vector<16x4xf32>
    %cst_49 = arith.constant dense<0.000000e+00> : vector<16x4xf32>
    %125 = tpu.matmul %123, %124, %cst_49 {dimension_numbers = #tpu.dot_dimension_numbers<[1], [0], [0], [1], [0, 0, 1, 1], [], []>} : vector<16x16xf32>, vector<16x4xf32>, vector<16x4xf32> -> vector<16x4xf32>
    %c0_50 = arith.constant 0 : index
    %c0_51 = arith.constant 0 : index
    %126 = vector.load %arg11[%c0_50, %c0_51] : memref<1x4xf32, #tpu.memory_space<vmem>>, vector<1x4xf32>
    %127 = vector.broadcast %126 : vector<1x4xf32> to vector<16x4xf32>
    %128 = arith.addf %125, %127 : vector<16x4xf32>
    %129 = arith.addf %128, %0 : vector<16x4xf32>
    %c0_52 = arith.constant 0 : index
    %c0_53 = arith.constant 0 : index
    %130 = vector.load %arg12[%c0_52, %c0_53] : memref<16x4xf32, #tpu.memory_space<vmem>>, vector<16x4xf32>
    tpu.vector_store %arg12[%c0_52, %c0_53], %129 {strides = array<i32>} : memref<16x4xf32, #tpu.memory_space<vmem>>, vector<16x4xf32>,
    return
  }
  func.func @transform_0(%arg0: i32) -> (i32, i32) {
    %c0_i32 = arith.constant 0 : i32
    %c0_i32_0 = arith.constant 0 : i32
    return %arg0, %c0_i32 : i32, i32
  }
  func.func @transform_1(%arg0: i32) -> (i32, i32) {
    %c0_i32 = arith.constant 0 : i32
    %c0_i32_0 = arith.constant 0 : i32
    %c0_i32_1 = arith.constant 0 : i32
    return %c0_i32, %c0_i32_0 : i32, i32
  }
  func.func @transform_2(%arg0: i32) -> (i32, i32) {
    %c0_i32 = arith.constant 0 : i32
    %c0_i32_0 = arith.constant 0 : i32
    %c0_i32_1 = arith.constant 0 : i32
    return %c0_i32, %c0_i32_0 : i32, i32
  }
  func.func @transform_3(%arg0: i32) -> (i32, i32) {
    %c0_i32 = arith.constant 0 : i32
    %c0_i32_0 = arith.constant 0 : i32
    %c0_i32_1 = arith.constant 0 : i32
    return %c0_i32, %c0_i32_0 : i32, i32
  }
  func.func @transform_4(%arg0: i32) -> (i32, i32) {
    %c0_i32 = arith.constant 0 : i32
    %c0_i32_0 = arith.constant 0 : i32
    %c0_i32_1 = arith.constant 0 : i32
    return %c0_i32, %c0_i32_0 : i32, i32
  }
  func.func @transform_5(%arg0: i32) -> (i32, i32) {
    %c0_i32 = arith.constant 0 : i32
    %c0_i32_0 = arith.constant 0 : i32
    %c0_i32_1 = arith.constant 0 : i32
    return %c0_i32, %c0_i32_0 : i32, i32
  }
  func.func @transform_6(%arg0: i32) -> (i32, i32) {
    %c0_i32 = arith.constant 0 : i32
    %c0_i32_0 = arith.constant 0 : i32
    %c0_i32_1 = arith.constant 0 : i32
    return %c0_i32, %c0_i32_0 : i32, i32
  }
  func.func @transform_7(%arg0: i32) -> (i32, i32) {
    %c0_i32 = arith.constant 0 : i32
    %c0_i32_0 = arith.constant 0 : i32
    %c0_i32_1 = arith.constant 0 : i32
    return %c0_i32, %c0_i32_0 : i32, i32
  }
  func.func @transform_8(%arg0: i32) -> (i32, i32) {
    %c0_i32 = arith.constant 0 : i32
    %c0_i32_0 = arith.constant 0 : i32
    %c0_i32_1 = arith.constant 0 : i32
    return %c0_i32, %c0_i32_0 : i32, i32
  }
  func.func @transform_9(%arg0: i32) -> (i32, i32) {
    %c0_i32 = arith.constant 0 : i32
    %c0_i32_0 = arith.constant 0 : i32
    %c0_i32_1 = arith.constant 0 : i32
    return %c0_i32, %c0_i32_0 : i32, i32
  }
  func.func @transform_10(%arg0: i32) -> (i32, i32) {
    %c0_i32 = arith.constant 0 : i32
    %c0_i32_0 = arith.constant 0 : i32
    %c0_i32_1 = arith.constant 0 : i32
    return %c0_i32, %c0_i32_0 : i32, i32
  }
  func.func @transform_11(%arg0: i32) -> (i32, i32) {
    %c0_i32 = arith.constant 0 : i32
    %c0_i32_0 = arith.constant 0 : i32
    return %arg0, %c0_i32 : i32, i32
  }
}

</mosaic_0001>

<bundles_post_ra>
// kernel: tpu_custom_call.1
= control target key start
LH: loop header
LB: loop body
LE: loop exit
PB: predicated region body
PF: predicated region fallthrough
CT: control target
= control target key end

     0   :  { %s982_s17 = smov 0   ;;  %s1077_s0 = inlined_call_operand.vmem [shape: f32[32,4], index: 0, kind: input, shape index: {}]   ;;  %s1078_s1 = inlined_call_operand.vmem [shape: f32[3,4], index: 1, kind: input, shape index: {}]   ;;  %s1079_s2 = inlined_call_operand.vmem [shape: f32[1,4], index: 2, kind: input, shape index: {}]   ;;  %s1080_s3 = inlined_call_operand.vmem [shape: f32[1,4], index: 3, kind: input, shape index: {}]   ;;  %s1081_s4 = inlined_call_operand.vmem [shape: f32[1,4], index: 4, kind: input, shape index: {}]   ;;  %s1082_s5 = inlined_call_operand.vmem [shape: f32[4,16], index: 5, kind: input, shape index: {}]   ;;  %s1083_s6 = inlined_call_operand.vmem [shape: f32[1,16], index: 6, kind: input, shape index: {}]   ;;  %s1084_s7 = inlined_call_operand.vmem [shape: f32[1,16], index: 7, kind: input, shape index: {}]   ;;  %s1085_s8 = inlined_call_operand.vmem [shape: f32[1,16], index: 8, kind: input, shape index: {}]   ;;  %s1086_s9 = inlined_call_operand.vmem [shape: f32[16,4], index: 9, kind: input, shape index: {}]   ;;  %s1087_s10 = inlined_call_operand.vmem [shape: f32[1,4], index: 10, kind: input, shape index: {}]   ;;  %s1088_s11 = inlined_call_operand.vmem [shape: f32[32,4], index: 11, kind: output, shape index: {}]  }
   0x1 LB: > { %s843_s18 = sadd.s32 4294967295, %s919_s17   ;;  %p847_p0 = scmp.ge.s32.totalorder %s919_s17, 1  ;;  %s919_s17 = sphi %s982_s17, %s21_s17  }
   0x2   : > { %p338_p1 = scmp.lt.s32.totalorder %s919_s17, 3 }
   0x4   : > { %p339_p2 = pnand %p847_p0, %p338_p1 }
   0x5   : > { %s848_s19 = sshll.u32 (!%p339_p2), %s843_s18, 1  ;;  %v392_v0 = vlaneseq (!%p339_p2)  ;;  %v399_v2 = vld [vmem:[%s1078_s1] sm:$0x7] (!%p339_p2)  ;;  %vm453_vm4 = vcmask (!%p339_p2), 31744   ;;  %vm513_vm5 = vcmask (!%p339_p2), 1043456   ;;  %vm650_vm8 = vcmask (!%p339_p2), 130048  }
   0x6   : > { %342 = sbr.rel (%p339_p2) target bundleno = 1029 (0x405), region = 64  ;;  %p379_p3 = scmp.lt.s32.totalorder (!%p339_p2), %s848_s19, 3  ;;  %v852_v30 = vld [vmem:[%s1079_s2] ss:$0 sm:$0xff] (!%p339_p2) }
   0x7   : > { %v990_v1 = vshrl.u32 (!%p339_p2), %v392_v0, 7  ;;  %v499_v47 = vld [vmem:[%s1082_s5] sm:$0xf] (!%p339_p2) }
   0x8   : > { %872 = vmatprep.subr.msk.mxu0 (!%p339_p2), %vm513_vm5, %v499_v47  ;;  %v853_v55 = vld [vmem:[%s1080_s3] ss:$0 sm:$0xff] (!%p339_p2) }
   0x9   : > { %v407_v3 = vsub.s32 (!%p339_p2), 0, %v990_v1  ;;  %v419_v4 = vsub.s32 (!%p339_p2), 1, %v990_v1  ;;  %v432_v5 = vsub.s32 (!%p339_p2), 2, %v990_v1  ;;  %v394_v7 = vadd.s32 (!%p339_p2), 8, %v990_v1  ;;  %873 = vmatpush3.msk.msra.mxu0 (!%p339_p2), %vm513_vm5, %v499_v47  ;;  %v854_v57 = vld [vmem:[%s1081_s4] ss:$0 sm:$0xff] (!%p339_p2) }
   0xa   : > { %vm402_vm0 = vcmp.lt.s32.totalorder (!%p339_p2), %v990_v1, 1  ;;  %vm427_vm1 = vcmp.lt.s32.totalorder (!%p339_p2), %v990_v1, 7  ;;  %vm395_vm2 = vcmp.ge.s32.totalorder (!%p339_p2), %v990_v1, 1  ;;  %v855_v0 = vld [vmem:[%s1083_s6] ss:$0 sm:$0xff] (!%p339_p2) }
   0xb   : > { %v420_v6 = vrot.slane (!%p339_p2), %v399_v2, %v419_v4  ;;  %v408_v10 = vrot.slane (!%p339_p2), %v399_v2, %v407_v3  ;;  %v433_v14 = vrot.slane (!%p339_p2), %v399_v2, %v432_v5  ;;  %vm398_vm3 = vcmp.lt.s32.totalorder (!%p339_p2), %v394_v7, 15 }
   0xd   : > { %s1090_s19 = smov (!%p379_p3, %s848_s19), 3 }
   0xe   : > { %s849_s22 = sshll.u32 %s1090_s19, 3 }
   0xf   : > { %s382_s25 = scalar_lea.vmem %s1077_s0, %s849_s22  ;;  %s388_s13 = scalar_lea.vmem %s1088_s11, %s849_s22 }
  0x10   : > { %v1007_v8 = vld [vmem:[%s382_s25] sm:$0xff]  ;;  %v1009_v9 = vld [vmem:[%s382_s25 + $0x8] sm:$0xff] }
  0x11   : > { %v400_v11 = vrot.slane %v1007_v8, 7  ;;  %v401_v12 = vrot.slane %v1009_v9, 7  ;;  %v425_v13 = vrot.slane %v1007_v8, 1  ;;  %v426_v15 = vrot.slane %v1009_v9, 1 }
  0x12   : > { %v422_v16 = vmul.f32 %v420_v6, %v1009_v9  ;;  %v421_v18 = vmul.f32 %v420_v6, %v1007_v8 }
  0x13   : > { %v404_v17 = vsel %vm402_vm0, %v401_v12, %v400_v11  ;;  %v403_v19 = vsel %vm402_vm0, %v400_v11, %v401_v12  ;;  %v428_v21 = vsel %vm427_vm1, %v425_v13, %v426_v15  ;;  %v429_v23 = vsel %vm427_vm1, %v426_v15, %v425_v13 }
  0x14   : > { %v409_v20 = vmul.f32 %v408_v10, %v404_v17  ;;  %v410_v22 = vmul.f32 %v408_v10, %v403_v19  ;;  %v434_v24 = vmul.f32 %v433_v14, %v428_v21  ;;  %v435_v25 = vmul.f32 %v433_v14, %v429_v23 }
  0x16   : > { %v415_v26 = vsel %vm395_vm2, %v409_v20, 0.0  ;;  %v424_v27 = vadd.f32 %v422_v16, %v410_v22  ;;  %v441_v29 = vsel %vm398_vm3, %v435_v25, 0.0 }
  0x17   : > { %v423_v28 = vadd.f32 %v421_v18, %v415_v26 }
  0x18   : > { %v443_v31 = vadd.f32 %v441_v29, %v424_v27 }
  0x19   : > { %v442_v32 = vadd.f32 %v434_v24, %v423_v28 }
  0x1a   : > { %v452_v34 = vadd.f32 %v852_v30, %v443_v31 }
  0x1b   : > { %v451_v33 = vadd.f32 %v852_v30, %v442_v32 }
  0x1c   : > { %v457_v36 = vsel %vm453_vm4, %v452_v34, 0.0 }
  0x1d   : > { %v454_v35 = vsel %vm453_vm4, %v451_v33, 0.0 }
  0x1e   : > { %455 = vadd.xlane.f32.xlu0 %v454_v35 }
  0x22   : > { %458 = vadd.xlane.f32.xlu0 %v457_v36 }
  0xab   : > { %v456_v37 = vpop.xlane.xlu0 %455 }
  0xac   : > { %v461_v38 = vmul.f32 0.25, %v456_v37 }
  0xae   : > { %v463_v39 = vsub.f32 %v451_v33, %v461_v38 }
  0xaf   : > { %v459_v40 = vpop.xlane.xlu0 %458 }
  0xb0   : > { %v462_v41 = vmul.f32 0.25, %v459_v40  ;;  %v465_v42 = vmul.f32 %v463_v39, %v463_v39 }
  0xb2   : > { %v464_v43 = vsub.f32 %v452_v34, %v462_v41  ;;  %v467_v44 = vsel %vm453_vm4, %v465_v42, 0.0 }
  0xb3   : > { %468 = vadd.xlane.f32.xlu1 %v467_v44 }
  0xb4   : > { %v466_v45 = vmul.f32 %v464_v43, %v464_v43 }
  0xb6   : > { %v470_v46 = vsel %vm453_vm4, %v466_v45, 0.0 }
  0xb7   : > { %471 = vadd.xlane.f32.xlu1 %v470_v46 }
 0x140   : > { %v469_v48 = vpop.xlane.xlu1 %468 }
 0x141   : > { %v473_v49 = vmul.f32 0.25, %v469_v48  ;;  %v921_v48 = vmov -1.0  }
 0x143   : > { %v475_v50 = vadd.f32 1e-06, %v473_v49 }
 0x144   : > { %v472_v51 = vpop.xlane.xlu1 %471 }
 0x145   : > { %897 = vrsqrt.f32 %v475_v50  ;;  %v474_v52 = vmul.f32 0.25, %v472_v51 }
 0x147   : > { %v476_v53 = vadd.f32 1e-06, %v474_v52 }
 0x149   : > { %899 = vrsqrt.f32 %v476_v53 }
 0x14f   : > { %v898_v54 = vpop.eup %897 }
 0x150   : > { %v479_v56 = vmul.f32 %v898_v54, %v463_v39 }
 0x152   : > { %v488_v58 = vmul.f32 %v853_v55, %v479_v56 }
 0x153   : > { %v900_v59 = vpop.eup %899 }
 0x154   : > { %v480_v60 = vmul.f32 %v900_v59, %v464_v43  ;;  %v497_v61 = vadd.f32 %v854_v57, %v488_v58 }
 0x156   : > { %v489_v62 = vmul.f32 %v853_v55, %v480_v60  ;;  %874 = vmatprep.mubr.msk.f32.mxu0 %vm453_vm4, %v497_v61 }
 0x158   : > { %v498_v63 = vadd.f32 %v854_v57, %v489_v62 }
 0x15a   : > { %875 = vmatmul.mubr.msk.f32.vlgmr.msra.gmra.mrb[0].mxu0 %vm453_vm4, %v498_v63 }
 0x22d   : > { %v876_v2 = vpop.f32.mrb[0].mxu0 }
 0x22e   : > { %v589_v4 = vadd.f32 %v876_v2, %v855_v0  ;;  %v583_v5 = vpop.f32.mrb[1].mxu0 }
 0x22f   : > { %v584_v6 = vadd.f32 %v855_v0, %v583_v5 }
 0x230   : > { %v595_v7 = vmul.f32 0.70710677, %v589_v4  ;;  %v593_v54 = vmul.f32 0.5, %v589_v4 }
 0x231   : > { %v594_v10 = vmul.f32 0.70710677, %v584_v6  ;;  %v592_v56 = vmul.f32 0.5, %v584_v6 }
 0x232   : > { %v601_v11 = vand.u32 2147483647, %v595_v7  ;;  %vm597_vm6 = vcmp.ge.f32.partialorder %v595_v7, 0.0 }
 0x233   : > { %v600_v12 = vand.u32 2147483647, %v594_v10  ;;  %vm596_vm7 = vcmp.ge.f32.partialorder %v594_v10, 0.0  ;;  %v599_v49 = vsel %vm597_vm6, 1.0, %v921_v48 }
 0x234   : > { %v603_v13 = vmul.f32 0.3275911, %v601_v11  ;;  %v629_v17 = vsub.f32 0.0, %v601_v11  ;;  %v598_v52 = vsel %vm596_vm7, 1.0, %v921_v48 }
 0x235   : > { %v602_v14 = vmul.f32 0.3275911, %v600_v12  ;;  %v628_v18 = vsub.f32 0.0, %v600_v12 }
 0x236   : > { %v605_v15 = vadd.f32 1.0, %v603_v13  ;;  %v631_v20 = vmul.f32 %v629_v17, %v601_v11  ;;  %v693_v17 = vld [vmem:[%s1086_s9] sm:$0xff] }
 0x237   : > { %v604_v16 = vadd.f32 1.0, %v602_v14  ;;  %v630_v23 = vmul.f32 %v628_v18, %v600_v12  ;;  %v694_v18 = vld [vmem:[%s1086_s9 + $0x8] sm:$0xff] }
 0x238   : > { %901 = vrcp.f32 %v605_v15  ;;  %v634_v26 = vmul.f32 1.442695, %v631_v20 }
 0x239   : > { %903 = vrcp.f32 %v604_v16  ;;  %v632_v29 = vmul.f32 1.442695, %v630_v23 }
 0x23a   : > { %905 = vpow2.f32 %v634_v26 }
 0x23b   : > { %907 = vpow2.f32 %v632_v29  ;;  %v859_v29 = vld [vmem:[%s1085_s8] ss:$0 sm:$0xff] }
 0x242   : > { %v902_v19 = vpop.eup %901 }
 0x243   : > { %v904_v21 = vpop.eup %903  ;;  %v611_v22 = vmul.f32 1.0614054, %v902_v19 }
 0x244   : > { %v610_v24 = vmul.f32 1.0614054, %v904_v21  ;;  %v906_v42 = vpop.eup %905 }
 0x245   : > { %v613_v25 = vadd.f32 -1.4531521, %v611_v22  ;;  %v908_v44 = vpop.eup %907 }
 0x246   : > { %v612_v27 = vadd.f32 -1.4531521, %v610_v24  ;;  %v646_v24 = vld [vmem:[%s1084_s7] sm:$0x1] }
 0x247   : > { %v615_v28 = vmul.f32 %v902_v19, %v613_v25 }
 0x248   : > { %v614_v30 = vmul.f32 %v904_v21, %v612_v27 }
 0x249   : > { %v617_v31 = vadd.f32 1.4214138, %v615_v28 }
 0x24a   : > { %v616_v32 = vadd.f32 1.4214138, %v614_v30 }
 0x24b   : > { %v619_v33 = vmul.f32 %v902_v19, %v617_v31 }
 0x24c   : > { %v618_v34 = vmul.f32 %v904_v21, %v616_v32 }
 0x24d   : > { %v621_v35 = vadd.f32 -0.28449672, %v619_v33 }
 0x24e   : > { %v620_v36 = vadd.f32 -0.28449672, %v618_v34  ;;  %v860_v34 = vld [vmem:[%s1087_s10] ss:$0 sm:$0xff] }
 0x24f   : > { %v623_v37 = vmul.f32 %v902_v19, %v621_v35 }
 0x250   : > { %v622_v38 = vmul.f32 %v904_v21, %v620_v36 }
 0x251   : > { %v625_v39 = vadd.f32 0.2548296, %v623_v37 }
 0x252   : > { %v624_v40 = vadd.f32 0.2548296, %v622_v38 }
 0x253   : > { %v627_v41 = vmul.f32 %v902_v19, %v625_v39  ;;  %v884_v19 = vpack.c.bf16 %v694_v18, %v693_v17 }
 0x254   : > { %v626_v43 = vmul.f32 %v904_v21, %v624_v40 }
 0x255   : > { %v637_v45 = vmul.f32 %v906_v42, %v627_v41  ;;  %885 = vmatprep.subr.bf16.mxu1 %v884_v19 }
 0x256   : > { %v636_v46 = vmul.f32 %v908_v44, %v626_v43  ;;  %887 = vmatpush3.bf16.msra.mxu1 %v884_v19 }
 0x257   : > { %v639_v47 = vsub.f32 1.0, %v637_v45 }
 0x258   : > { %v638_v50 = vsub.f32 1.0, %v636_v46 }
 0x259   : > { %v641_v51 = vmul.f32 %v639_v47, %v599_v49 }
 0x25a   : > { %v640_v53 = vmul.f32 %v638_v50, %v598_v52 }
 0x25b   : > { %v643_v55 = vadd.f32 1.0, %v641_v51 }
 0x25c   : > { %v642_v57 = vadd.f32 1.0, %v640_v53 }
 0x25d   : > { %v645_v58 = vmul.f32 %v643_v55, %v593_v54 }
 0x25e   : > { %v644_v59 = vmul.f32 %v642_v57, %v592_v56 }
 0x25f   : > { %v649_v60 = vmul.f32 %v645_v58, %v645_v58 }
 0x260   : > { %v648_v61 = vmul.f32 %v644_v59, %v644_v59 }
 0x261   : > { %v652_v62 = vsel %vm650_vm8, %v649_v60, 0.0 }
 0x262   : > { %v651_v63 = vsel %vm650_vm8, %v648_v61, 0.0 }
 0x263   : > { %v653_v0 = vadd.f32 %v652_v62, %v651_v63 }
 0x265   : > { %v654_v2 = vrot.slane %v653_v0, 4 }
 0x267   : > { %v655_v5 = vadd.f32 %v654_v2, %v653_v0 }
 0x269   : > { %v656_v7 = vrot.slane %v655_v5, 2 }
 0x26b   : > { %v657_v10 = vadd.f32 %v656_v7, %v655_v5 }
 0x26d   : > { %v658_v11 = vrot.slane %v657_v10, 1 }
 0x26f   : > { %v659_v12 = vadd.f32 %v658_v11, %v657_v10 }
 0x271   : > { %909 = vrsqrt.f32 %v659_v12  ;;  %vm662_vm9 = vcmp.eq.f32.partialorder %v659_v12, inf  ;;  %v665_v13 = vand.u32 2147483648, %v659_v12  ;;  %vm664_vm10 = vcmp.eq.f32.partialorder %v659_v12, 0.0 }
 0x27b   : > { %v910_v4 = vpop.eup %909 }
 0x27c   : > { %v661_v6 = vmul.f32 %v910_v4, %v659_v12 }
 0x27e   : > { %v663_v14 = vsel %vm662_vm9, %v659_v12, %v661_v6 }
 0x27f   : > { %v666_v15 = vsel %vm664_vm10, %v665_v13, %v663_v14 }
 0x280   : > { %v667_v16 = vsel %vm650_vm8, %v666_v15, 0.0 }
 0x281   : > { %668 = vadd.xlane.f32.xlu0 %v667_v16 }
 0x30e   : > { %v669_v20 = vpop.xlane.xlu0 %668 }
 0x30f   : > { %v671_v21 = vmul.f32 0.0625, %v669_v20 }
 0x311   : > { %v672_v22 = vadd.f32 1e-06, %v671_v21 }
 0x313   : > { %911 = vrcp.f32 %v672_v22 }
 0x31d   : > { %v912_v23 = vpop.eup %911 }
 0x31e   : > { %v674_v25 = vmul.f32 %v912_v23, %v666_v15 }
 0x320   : > { %v675_v26 = vmul.f32 %v674_v25, %v646_v24 }
 0x322   : > { %v676_v27 = vadd.f32 1.0, %v675_v26 }
 0x324   : > { %v681_v28 = vrot.slane %v676_v27, %v407_v3 }
 0x326   : > { %v683_v30 = vmul.f32 %v681_v28, %v644_v59  ;;  %v684_v31 = vmul.f32 %v681_v28, %v645_v58 }
 0x328   : > { %v691_v32 = vadd.f32 %v859_v29, %v683_v30  ;;  %v692_v33 = vadd.f32 %v859_v29, %v684_v31 }
 0x32a   : > { %881 = vmatprep.mubr.msk.f32.mxu1 %vm650_vm8, %v691_v32 }
 0x32b   : > { %882 = vmatmul.mubr.msk.f32.vlgmr.msra.gmra.mrb[0].mxu1 %vm650_vm8, %v692_v33 }
 0x3fe   : > { %v883_v35 = vpop.f32.mrb[0].mxu1 }
 0x3ff   : > { %v780_v36 = vadd.f32 %v883_v35, %v860_v34  ;;  %v774_v1 = vpop.f32.mrb[1].mxu1 }
 0x400   : > { %v775_v3 = vadd.f32 %v860_v34, %v774_v1 }
 0x401   : > { %v784_v38 = vadd.f32 %v780_v36, %v1009_v9 }
 0x402   : > { %v783_v37 = vadd.f32 %v775_v3, %v1007_v8 }
 0x403   : > { %786 = vst.msk [vmem:[%s388_s13 + $0x8] sm:$0xff] %vm453_vm4, %v784_v38 }
 0x404   : > { %785 = vst.msk [vmem:[%s388_s13] sm:$0xff] %vm453_vm4, %v783_v37 }
 0x405 PF: > { %s21_s17 = sadd.s32 1, %s919_s17  }
 0x406   : > { %p18_p4 = scmp.ge.s32.totalorder %s21_s17, 4  }
 0x408   :  { %20 = sbr.rel (!%p18_p4) target bundleno = 1 (0x1), region = 94 }

</bundles_post_ra>
